<compile_context>
chip_gen: v5e
topology: v5e:2x2
jax: 0.10.0
libtpu: 0.0.40
codegen_flags: <defaults>
</compile_context>

<pallas_src>
import jax
import jax.numpy as jnp
from jax.experimental import pallas as pl
from jax.experimental.pallas import tpu as pltpu

# ImageNet normalization constants from the module's __init__ (the module has no
# learnable parameters; these are its only "weights").
_MEAN = (0.485, 0.456, 0.406)
_STD = (0.229, 0.224, 0.225)

_LANE = 128
# ~4 MiB of f32 output per block (~1 MiB uint8 input) -> ~10 MiB double-buffered.
_TARGET_BLOCK_ELEMS = (4 << 20) // 4


def _transform_kernel(scale_ref, bias_ref, x_ref, o_ref):
    # scale_ref / bias_ref: (rows_blk, 1) float32 in VMEM (per-row affine constants).
    # x_ref: (rows_blk, cols_blk) uint8 tile.
    # o_ref: (rows_blk, cols_blk) float32 tile.
    xf = x_ref[...].astype(jnp.float32)                 # ToDtype cast (the /255 is folded into scale)
    o_ref[...] = xf * scale_ref[...] + bias_ref[...]    # Normalize, broadcast over lanes


def _largest_divisor_tile(total, unit, cap):
    """Largest multiple of `unit` that divides `total` and is <= cap (assumes total % unit == 0)."""
    cap = max(unit, (cap // unit) * unit)
    d = min(cap, total)
    d -= d % unit
    while d >= unit:
        if total % d == 0:
            return d
        d -= unit
    return total


def _pick_tiles(R, L):
    """Pick (rows_blk, cols_blk) for the flattened (R, L) array."""
    if R * L <= _TARGET_BLOCK_ELEMS:
        return R, L  # single block, single grid step

    if L % _LANE == 0:
        cols_blk = _largest_divisor_tile(L, _LANE, _TARGET_BLOCK_ELEMS)
    else:
        cols_blk = L  # full extent is always legal (rare for image data)

    rows_cap = max(1, _TARGET_BLOCK_ELEMS // cols_blk)
    if R <= 8 or rows_cap >= R:
        rows_blk = R
    else:
        rows_blk = max(8, min((rows_cap // 8) * 8, (R // 8) * 8))
    return rows_blk, cols_blk


def shufflenet_v2_x0_5_face_transforms(x):
    """x: uint8 array, shape (N, 3, H, W). Returns float32 (N, 3, H, W)."""
    N, C, H, W = x.shape
    assert C == len(_MEAN), "Normalize expects 3 channels"

    R, L = N * C, H * W

    mean = jnp.asarray(_MEAN, jnp.float32)
    std = jnp.asarray(_STD, jnp.float32)
    # (x/255 - mean)/std  ==  x * scale + bias
    scale_c = (1.0 / (255.0 * std)).astype(jnp.float32)   # (C,)
    bias_c = (-mean / std).astype(jnp.float32)             # (C,)
    # Per-row constants for the flattened (N*C, H*W) layout.
    scale = jnp.tile(scale_c, N).reshape(R, 1)
    bias = jnp.tile(bias_c, N).reshape(R, 1)

    # Free reshape for contiguous NCHW: lane-dense last dim of size H*W.
    x2 = x.reshape(R, L)

    rows_blk, cols_blk = _pick_tiles(R, L)
    grid = (pl.cdiv(R, rows_blk), pl.cdiv(L, cols_blk))

    out2 = pl.pallas_call(
        _transform_kernel,
        out_shape=jax.ShapeDtypeStruct((R, L), jnp.float32),
        grid=grid,
        in_specs=[
            # Per-row affine constants, blocked on the same row axis as x.
            pl.BlockSpec((rows_blk, 1), lambda i, j: (i, 0)),
            pl.BlockSpec((rows_blk, 1), lambda i, j: (i, 0)),
            # Large lane-dense image tile.
            pl.BlockSpec((rows_blk, cols_blk), lambda i, j: (i, j)),
        ],
        out_specs=pl.BlockSpec((rows_blk, cols_blk), lambda i, j: (i, j)),
        compiler_params=pltpu.CompilerParams(
            dimension_semantics=("parallel", "parallel")
        ),
    )(scale, bias, x2)

    return out2.reshape(N, C, H, W)


def _reference(x):
    mean = jnp.asarray(_MEAN, jnp.float32).reshape(1, -1, 1, 1)
    std = jnp.asarray(_STD, jnp.float32).reshape(1, -1, 1, 1)
    return (x.astype(jnp.float32) / 255.0 - mean) / std


if __name__ == "__main__":
    key = jax.random.PRNGKey(0)
    # Small synthetic "face" batch: N=2, C=3, H=W=16, uint8 pixel values.
    x = jax.random.randint(key, (2, 3, 16, 16), 0, 256, dtype=jnp.int32).astype(
        jnp.uint8
    )

    out = shufflenet_v2_x0_5_face_transforms(x)
    out = jax.block_until_ready(out)

    ref = _reference(x)
    assert out.shape == (2, 3, 16, 16)
    assert out.dtype == jnp.float32
    assert jnp.allclose(out, ref, atol=1e-5, rtol=1e-5)

    print("KERNEL_OK")
</pallas_src>

<mosaic_0001>
module attributes {stable_mosaic.version = 11 : i64} {
  func.func @_transform_kernel(%arg0: i32, %arg1: i32, %arg2: memref<6x1xf32, #tpu.memory_space<vmem>>, %arg3: memref<6x1xf32, #tpu.memory_space<vmem>>, %arg4: memref<6x256xi8, #tpu.memory_space<vmem>>, %arg5: memref<6x256xf32, #tpu.memory_space<vmem>>) attributes {dimension_semantics = [#tpu.dimension_semantics<parallel>, #tpu.dimension_semantics<parallel>], iteration_bounds = array<i64: 1, 1>, scalar_prefetch = 0 : i64, scratch_operands = 0 : i64, tpu.core_type = #tpu.core_type<tc>, window_params = [{transform_indices = @transform_0, window_bounds = array<i64: 6, 1>}, {transform_indices = @transform_1, window_bounds = array<i64: 6, 1>}, {transform_indices = @transform_2, window_bounds = array<i64: 6, 256>}, {transform_indices = @transform_3, window_bounds = array<i64: 6, 256>}]} {
    %c0 = arith.constant 0 : index
    %c0_0 = arith.constant 0 : index
    %0 = vector.load %arg4[%c0, %c0_0] : memref<6x256xi8, #tpu.memory_space<vmem>>, vector<6x256xi8>
    %1 = arith.uitofp %0 : vector<6x256xi8> to vector<6x256xf32>
    %c0_1 = arith.constant 0 : index
    %c0_2 = arith.constant 0 : index
    %2 = vector.load %arg2[%c0_1, %c0_2] : memref<6x1xf32, #tpu.memory_space<vmem>>, vector<6x1xf32>
    %3 = vector.broadcast %2 : vector<6x1xf32> to vector<6x256xf32>
    %4 = arith.mulf %1, %3 : vector<6x256xf32>
    %c0_3 = arith.constant 0 : index
    %c0_4 = arith.constant 0 : index
    %5 = vector.load %arg3[%c0_3, %c0_4] : memref<6x1xf32, #tpu.memory_space<vmem>>, vector<6x1xf32>
    %6 = vector.broadcast %5 : vector<6x1xf32> to vector<6x256xf32>
    %7 = arith.addf %4, %6 : vector<6x256xf32>
    %c0_5 = arith.constant 0 : index
    %c0_6 = arith.constant 0 : index
    %8 = vector.load %arg5[%c0_5, %c0_6] : memref<6x256xf32, #tpu.memory_space<vmem>>, vector<6x256xf32>
    tpu.vector_store %arg5[%c0_5, %c0_6], %7 {strides = array<i32>} : memref<6x256xf32, #tpu.memory_space<vmem>>, vector<6x256xf32>,
    return
  }
  func.func @transform_0(%arg0: i32, %arg1: i32) -> (i32, i32) {
    %c0_i32 = arith.constant 0 : i32
    %c0_i32_0 = arith.constant 0 : i32
    return %arg0, %c0_i32 : i32, i32
  }
  func.func @transform_1(%arg0: i32, %arg1: i32) -> (i32, i32) {
    %c0_i32 = arith.constant 0 : i32
    %c0_i32_0 = arith.constant 0 : i32
    return %arg0, %c0_i32 : i32, i32
  }
  func.func @transform_2(%arg0: i32, %arg1: i32) -> (i32, i32) {
    %c0_i32 = arith.constant 0 : i32
    return %arg0, %arg1 : i32, i32
  }
  func.func @transform_3(%arg0: i32, %arg1: i32) -> (i32, i32) {
    %c0_i32 = arith.constant 0 : i32
    return %arg0, %arg1 : i32, i32
  }
}

</mosaic_0001>

<bundles_post_ra>
// kernel: tpu_custom_call.1
= control target key start
LH: loop header
LB: loop body
LE: loop exit
PB: predicated region body
PF: predicated region fallthrough
CT: control target
= control target key end

     0   :  { %v85_v1 = vmov 0   ;;  %s119_s0 = inlined_call_operand.vmem [shape: f32[6,1], index: 0, kind: input, shape index: {}]   ;;  %s120_s1 = inlined_call_operand.vmem [shape: f32[6,1], index: 1, kind: input, shape index: {}]   ;;  %s121_s2 = inlined_call_operand.vmem [shape: u8[6,256], index: 2, kind: input, shape index: {}]   ;;  %s122_s3 = inlined_call_operand.hbm [shape: f32[6,256], index: 3, kind: output, shape index: {}]  }
   0x1   :  { %v22_v0 = vld [vmem:[%s119_s0] sm:$0x3f]  ;;  %58 = vset.pattern.permute.xlu0 %v85_v1 }
   0x2   :  { %8 = vsyncpa [#allocation3], 0  ;;  %25 = vperm.xlu0 %58, %v22_v0   ;;  %v30_v2 = vld [vmem:[%s120_s1] sm:$0x3f]  ;;  %s86_s0 = smov [#allocation2]   ;;  %s47_s1 = sshll.u32 %s122_s3, 4  ;;  %s48_s1 = int_to_ptr.hbm [resolvable:$true] %s47_s1 }
   0x3   :  { %v15_v3 = vld [vmem:[%s121_s2] sm:$0xf]  ;;  %s45_s18 = sshll.u32 %s86_s0, 4  ;;  %s46_s18 = int_to_ptr.vmem [resolvable:$true] %s45_s18 }
   0x4   :  { %v16_v4 = vunpack.c.0.s8 %v15_v3  ;;  %v17_v5 = vunpack.c.1.s8 %v15_v3 }
   0x6   :  { %v18_v6 = vand.u32 255, %v16_v4  ;;  %v19_v7 = vand.u32 255, %v17_v5 }
   0x8   :  { %v20_v9 = vcvt.s32.f32 %v18_v6  ;;  %v21_v10 = vcvt.s32.f32 %v19_v7 }
   0xa   :  { %33 = vperm.xlu0 %58, %v30_v2  }
  0x74   :  { %v26_v8 = vpop.permute.xlu0 %25 }
  0x75   :  { %v28_v11 = vmul.f32 %v26_v8, %v20_v9  ;;  %v29_v12 = vmul.f32 %v26_v8, %v21_v10 }
  0x7c   :  { %v34_v13 = vpop.permute.xlu0 %33 }
  0x7d   :  { %v36_v14 = vadd.f32 %v34_v13, %v28_v11  ;;  %v37_v15 = vadd.f32 %v34_v13, %v29_v12 }
  0x7f   :  { %38 = vst [vmem:[#allocation2] sm:$0x3f] %v36_v14 }
  0x80   :  { %39 = vst [vmem:[#allocation2 + $0x8] sm:$0x3f] %v37_v15 }
  0x81   :  { %50 = dma.vmem_to_hbm [thread:$0]  %s46_s18, 256, %s48_s1, [#allocation3]  }
  0x82   :  { %83 = dma.done.wait [#allocation3], 256  }
  0x83   :  { %84 = vsyncadd [#allocation3], 4294967040 }
  0x84   :  { %55 = vsyncpa [#allocation3], 1 }

</bundles_post_ra>
